<compile_context>
chip_gen: v7x
topology: tpu7x:2x2x1
jax: 0.10.0
libtpu: 0.0.40
codegen_flags: <defaults>
</compile_context>

<pallas_src>
import functools
import math

import jax
import jax.numpy as jnp
from jax.experimental import pallas as pl
from jax.experimental.pallas import tpu as pltpu


# --------------------------------------------------------------------------
# Small helpers
# --------------------------------------------------------------------------

def _round_up(a: int, b: int) -> int:
    return (a + b - 1) // b * b


def _cdiv(a: int, b: int) -> int:
    return (a + b - 1) // b


def _pick_divisor_tile(dim_pad: int, cap: int, quantum: int = 128) -> int:
    """Largest multiple of `quantum` that is <= cap and divides dim_pad."""
    cap = max(quantum, min(cap, dim_pad))
    cap = cap // quantum * quantum
    for t in range(cap, quantum - 1, -quantum):
        if dim_pad % t == 0:
            return t
    return quantum


def _vmem_budget_bytes() -> int:
    """Usable VMEM budget for this TPU generation (headroom left for Mosaic)."""
    cap = 64 << 20  # conservative fallback = v7x physical VMEM per TensorCore
    try:
        cap = int(getattr(pltpu.get_tpu_info(), "vmem_capacity_bytes", cap))
    except Exception:
        pass
    # v7x (64 MiB) -> 48 MiB usable; v5e/v6e (128 MiB) -> 100 MiB usable.
    return max(min(cap - (16 << 20), 100 << 20), 24 << 20)


# --------------------------------------------------------------------------
# Kernels
# --------------------------------------------------------------------------

def _mm_kernel(x_ref, w_ref, o_ref, *, precision):
    """Single-k-step path: o = x @ w, no accumulator scratch."""
    o_ref[...] = jnp.dot(
        x_ref[...], w_ref[...],
        preferred_element_type=jnp.float32, precision=precision,
    ).astype(o_ref.dtype)


def _mm_bias_kernel(x_ref, w_ref, b_ref, o_ref, *, precision):
    o_ref[...] = (
        jnp.dot(x_ref[...], w_ref[...],
                preferred_element_type=jnp.float32, precision=precision)
        + b_ref[...]
    ).astype(o_ref.dtype)


def _mm_acc_kernel(x_ref, w_ref, o_ref, acc_ref, *, precision):
    """Multi-k-step path: f32 accumulation over the contraction grid axis."""
    k = pl.program_id(2)

    @pl.when(k == 0)
    def _():
        acc_ref[...] = jnp.zeros_like(acc_ref)

    acc_ref[...] += jnp.dot(
        x_ref[...], w_ref[...],
        preferred_element_type=jnp.float32, precision=precision,
    )

    @pl.when(k == pl.num_programs(2) - 1)
    def _():
        o_ref[...] = acc_ref[...].astype(o_ref.dtype)


def _mm_acc_bias_kernel(x_ref, w_ref, b_ref, o_ref, acc_ref, *, precision):
    k = pl.program_id(2)

    @pl.when(k == 0)
    def _():
        acc_ref[...] = jnp.zeros_like(acc_ref)

    acc_ref[...] += jnp.dot(
        x_ref[...], w_ref[...],
        preferred_element_type=jnp.float32, precision=precision,
    )

    @pl.when(k == pl.num_programs(2) - 1)
    def _():
        o_ref[...] = (acc_ref[...] + b_ref[...]).astype(o_ref.dtype)


# --------------------------------------------------------------------------
# Tile selection
# --------------------------------------------------------------------------

def _single_step_tiles(M_pad, K_pad, N_pad, xsz, wsz, osz, has_bias, budget, sub):
    """Pick (tm, tn) for the no-accumulator single-k-step path, or None.

    Working-set accounting includes the pipeline's 2x buffering of every
    operand (weight included), so raising the resident threshold stays safe.
    """
    def need(tm, tn):
        return (2 * tm * K_pad * xsz        # x slab (double buffered)
                + 2 * K_pad * tn * wsz      # weight slab (double buffered)
                + 2 * tm * tn * osz         # output slab (double buffered)
                + (2 * tn * 4 if has_bias else 0))

    # Prefer the largest tn: with the N axis outermost the weight is then
    # streamed from HBM exactly once.
    tn_cands = [N_pad] + [t for t in (2048, 1024, 512, 256, 128)
                          if t < N_pad and N_pad % t == 0]
    for tn in tn_cands:
        tm = max(sub, min(512, M_pad) // sub * sub)
        while tm > sub and need(tm, tn) > budget:
            tm = max(sub, (tm // 2) // sub * sub)
        if need(tm, tn) <= budget and tm >= min(128, M_pad):
            return tm, tn
    return None


# --------------------------------------------------------------------------
# Public API
# --------------------------------------------------------------------------

def prepare_celora_params(weight, bias=None, compute_dtype=jnp.bfloat16):
    """Hoisted, once-per-layer weight preparation.

    Transposes the PyTorch-layout (out_features, in_features) weight to (K, N),
    casts it to the MXU compute dtype (bf16 by default) and zero-pads K/N to
    multiples of 128.  Cache the result and reuse it for every forward call so
    no per-call XLA transpose/cast/pad is paid.
    """
    N, K = weight.shape
    wT = jnp.asarray(weight).T.astype(compute_dtype)          # (K, N)
    K_pad, N_pad = _round_up(K, 128), _round_up(N, 128)
    if (K_pad, N_pad) != (K, N):
        wT = jnp.pad(wT, ((0, K_pad - K), (0, N_pad - N)))
    b2d = None
    if bias is not None:
        b2d = jnp.asarray(bias).reshape(1, N).astype(jnp.float32)
        if N_pad != N:
            b2d = jnp.pad(b2d, ((0, 0), (0, N_pad - N)))
    return wT, b2d


@functools.partial(
    jax.jit, static_argnames=("out_features", "force_tiled", "precision"))
def celora_linear_prepared(x, wT_pad, bias_pad=None, *, out_features,
                           force_tiled=False, precision=None):
    """Forward pass using a weight prepared by prepare_celora_params().

    x:        (..., in_features), any float dtype (output keeps this dtype).
    wT_pad:   (K_pad, N_pad) pre-transposed / padded weight in compute dtype.
    bias_pad: (1, N_pad) f32 or None.
    precision: optional jax.lax.Precision for the in-kernel dot (e.g. HIGHEST
               for strict f32 parity when the compute dtype is float32).
    """
    orig_shape = x.shape
    K = orig_shape[-1]
    K_pad, N_pad = wT_pad.shape
    N = out_features
    out_dtype = x.dtype
    cdt = wT_pad.dtype
    has_bias = bias_pad is not None

    x2d = x.reshape(-1, K).astype(cdt)
    M = x2d.shape[0]

    xsz = jnp.dtype(cdt).itemsize
    wsz = xsz
    osz = jnp.dtype(out_dtype).itemsize
    sub = max(8, 32 // xsz)            # sublane multiple for the M block dim

    # Activation is padded only for ragged K / non-sublane-aligned M tails;
    # tile-induced over-padding is avoided (cdiv grids absorb partial blocks).
    M_pad = _round_up(M, sub)
    if (M_pad, K_pad) != (M, K):
        x2d = jnp.pad(x2d, ((0, M_pad - M), (0, K_pad - K)))

    budget = _vmem_budget_bytes()
    fit_budget = budget * 8 // 10
    out_shape = jax.ShapeDtypeStruct((M_pad, N_pad), out_dtype)

    single = None
    if not force_tiled:
        single = _single_step_tiles(M_pad, K_pad, N_pad, xsz, wsz, osz,
                                    has_bias, fit_budget, sub)

    if single is not None:
        # ---------------- single-k-step / weight-resident path -------------
        tm, tn = single
        # Keep >= 2 grid steps when possible so both v7x TensorCores get work.
        if _cdiv(M_pad, tm) * _cdiv(N_pad, tn) == 1:
            if M_pad >= 2 * sub:
                tm = _round_up(_cdiv(M_pad, 2), sub)
            elif tn % 256 == 0:
                tn = tn // 2
        grid = (_cdiv(N_pad, tn), _cdiv(M_pad, tm))   # N outer: weight read once
        ws = (2 * tm * K_pad * xsz + 2 * K_pad * tn * wsz + 2 * tm * tn * osz
              + (2 * tn * 4 if has_bias else 0))
        vmem_limit = int(min(max(ws * 3 // 2, 32 << 20), budget))
        cparams = pltpu.CompilerParams(
            dimension_semantics=("parallel", "parallel"),
            vmem_limit_bytes=vmem_limit)

        x_spec = pl.BlockSpec((tm, K_pad), lambda j, i: (i, 0))
        w_spec = pl.BlockSpec((K_pad, tn), lambda j, i: (0, j))
        o_spec = pl.BlockSpec((tm, tn), lambda j, i: (i, j))

        if has_bias:
            b_spec = pl.BlockSpec((1, tn), lambda j, i: (0, j))
            out2d = pl.pallas_call(
                functools.partial(_mm_bias_kernel, precision=precision),
                out_shape=out_shape,
                grid_spec=pltpu.PrefetchScalarGridSpec(
                    num_scalar_prefetch=0, grid=grid,
                    in_specs=[x_spec, w_spec, b_spec], out_specs=o_spec),
                compiler_params=cparams,
            )(x2d, wT_pad, bias_pad)
        else:
            out2d = pl.pallas_call(
                functools.partial(_mm_kernel, precision=precision),
                out_shape=out_shape,
                grid_spec=pltpu.PrefetchScalarGridSpec(
                    num_scalar_prefetch=0, grid=grid,
                    in_specs=[x_spec, w_spec], out_specs=o_spec),
                compiler_params=cparams,
            )(x2d, wT_pad)
    else:
        # ---------------- multi-k tiled path with f32 accumulator ----------
        tm = max(sub, min(512, M_pad) // sub * sub)
        tn = _pick_divisor_tile(N_pad, 1024)
        tk = _pick_divisor_tile(K_pad, 128 if force_tiled else 2048)

        def need(tm_, tn_, tk_):
            return (2 * tm_ * tk_ * xsz + 2 * tk_ * tn_ * wsz
                    + 2 * tm_ * tn_ * osz + tm_ * tn_ * 4
                    + (2 * tn_ * 4 if has_bias else 0))

        while need(tm, tn, tk) > fit_budget:
            if tk > 128:
                tk = _pick_divisor_tile(K_pad, tk // 2)
            elif tn > 128:
                tn = _pick_divisor_tile(N_pad, tn // 2)
            elif tm > sub:
                tm = max(sub, (tm // 2) // sub * sub)
            else:
                break

        grid = (_cdiv(M_pad, tm), _cdiv(N_pad, tn), K_pad // tk)
        ws = need(tm, tn, tk)
        vmem_limit = int(min(max(ws * 3 // 2, 32 << 20), budget))
        cparams = pltpu.CompilerParams(
            dimension_semantics=("parallel", "parallel", "arbitrary"),
            vmem_limit_bytes=vmem_limit)

        x_spec = pl.BlockSpec((tm, tk), lambda i, j, k: (i, k))
        w_spec = pl.BlockSpec((tk, tn), lambda i, j, k: (k, j))
        o_spec = pl.BlockSpec((tm, tn), lambda i, j, k: (i, j))
        scratch = [pltpu.VMEM((tm, tn), jnp.float32)]

        if has_bias:
            b_spec = pl.BlockSpec((1, tn), lambda i, j, k: (0, j))
            out2d = pl.pallas_call(
                functools.partial(_mm_acc_bias_kernel, precision=precision),
                out_shape=out_shape,
                grid_spec=pltpu.PrefetchScalarGridSpec(
                    num_scalar_prefetch=0, grid=grid,
                    in_specs=[x_spec, w_spec, b_spec], out_specs=o_spec,
                    scratch_shapes=scratch),
                compiler_params=cparams,
            )(x2d, wT_pad, bias_pad)
        else:
            out2d = pl.pallas_call(
                functools.partial(_mm_acc_kernel, precision=precision),
                out_shape=out_shape,
                grid_spec=pltpu.PrefetchScalarGridSpec(
                    num_scalar_prefetch=0, grid=grid,
                    in_specs=[x_spec, w_spec], out_specs=o_spec,
                    scratch_shapes=scratch),
                compiler_params=cparams,
            )(x2d, wT_pad)

    out2d = out2d[:M, :N]
    return out2d.reshape(*orig_shape[:-1], N)


def celora_linear(x, weight, bias=None, *, compute_dtype=jnp.bfloat16,
                  force_tiled=False, precision=None):
    """One-shot convenience wrapper (re-prepares the weight on every call).

    For repeated forward passes, call prepare_celora_params() once per layer
    and use celora_linear_prepared() directly.
    """
    wT_pad, b2d = prepare_celora_params(weight, bias, compute_dtype)
    return celora_linear_prepared(
        x, wT_pad, b2d, out_features=weight.shape[0],
        force_tiled=force_tiled, precision=precision)


# --------------------------------------------------------------------------
# Parameter init mirroring nn.Linear / reset_parameters, and a reference
# --------------------------------------------------------------------------

def init_celora_linear_params(key, in_features, out_features, use_bias):
    wkey, bkey = jax.random.split(key)
    bound = 1.0 / math.sqrt(in_features)
    weight = jax.random.uniform(
        wkey, (out_features, in_features), jnp.float32, minval=-bound, maxval=bound)
    bias = None
    if use_bias:
        bias = jax.random.uniform(
            bkey, (out_features,), jnp.float32, minval=-bound, maxval=bound)
    return weight, bias


def _reference(x, weight, bias):
    """High-precision reference: x @ weight.T (+ bias)."""
    K = weight.shape[1]
    y = jax.lax.dot_general(
        x.reshape(-1, K), weight, (((1,), (1,)), ((), ())),
        precision=jax.lax.Precision.HIGHEST)
    if bias is not None:
        y = y + bias[None, :]
    return y.reshape(*x.shape[:-1], weight.shape[0])


# --------------------------------------------------------------------------
# Self-test
# --------------------------------------------------------------------------

if __name__ == "__main__":
    B, S = 2, 8
    in_features, out_features = 256, 128

    key = jax.random.PRNGKey(0)
    kx, kp, k2x, k2p = jax.random.split(key, 4)

    x = jax.random.normal(kx, (B, S, in_features), dtype=jnp.float32)
    weight, bias = init_celora_linear_params(kp, in_features, out_features, True)
    ref = _reference(x, weight, bias)

    # 1) Default path: bf16 MXU operands + f32 accumulation, hoisted weight prep.
    wT_pad, b_pad = prepare_celora_params(weight, bias)          # once per layer
    out = celora_linear_prepared(x, wT_pad, b_pad, out_features=out_features)
    jax.block_until_ready(out)
    assert out.shape == (B, S, out_features)
    assert jnp.allclose(out, ref, atol=5e-2, rtol=5e-2)

    # 2) bias=None (module default bias=False) -> dedicated no-bias kernel.
    out_nb = celora_linear(x, weight, None)
    jax.block_until_ready(out_nb)
    assert jnp.allclose(out_nb, _reference(x, weight, None), atol=5e-2, rtol=5e-2)

    # 3) Multi-k accumulator path, forced at small K to exercise it.
    out_t = celora_linear(x, weight, bias, force_tiled=True)
    jax.block_until_ready(out_t)
    assert jnp.allclose(out_t, ref, atol=5e-2, rtol=5e-2)

    # 4) Explicit f32 MXU-operand opt-out.
    out_f32 = celora_linear(x, weight, bias, compute_dtype=jnp.float32)
    jax.block_until_ready(out_f32)
    assert jnp.allclose(out_f32, ref, atol=5e-2, rtol=5e-2)

    # 5) Ragged shapes exercise M/K/N padding and output slicing.
    B2, S2, in2, out2 = 2, 5, 200, 130
    x2 = jax.random.normal(k2x, (B2, S2, in2), dtype=jnp.float32)
    w2, b2 = init_celora_linear_params(k2p, in2, out2, True)
    o2 = celora_linear(x2, w2, b2)
    jax.block_until_ready(o2)
    assert o2.shape == (B2, S2, out2)
    assert jnp.allclose(o2, _reference(x2, w2, b2), atol=5e-2, rtol=5e-2)

    # 6) Multi-block streaming: weight stays resident, x streamed in row slabs.
    B3, S3, in3, out3 = 4, 64, 512, 384
    x3 = jax.random.normal(kx, (B3, S3, in3), dtype=jnp.float32)
    w3, b3 = init_celora_linear_params(k2p, in3, out3, True)
    o3 = celora_linear(x3, w3, b3)
    jax.block_until_ready(o3)
    assert jnp.allclose(o3, _reference(x3, w3, b3), atol=5e-2, rtol=5e-2)

    print("KERNEL_OK")
</pallas_src>

<mosaic_0001>
module attributes {stable_mosaic.version = 11 : i64} {
  func.func @_mm_bias_kernel(%arg0: i32, %arg1: i32, %arg2: memref<16x256xbf16, #tpu.memory_space<vmem>>, %arg3: memref<256x128xbf16, #tpu.memory_space<vmem>>, %arg4: memref<1x128xf32, #tpu.memory_space<vmem>>, %arg5: memref<16x128xf32, #tpu.memory_space<vmem>>) attributes {dimension_semantics = [#tpu.dimension_semantics<parallel>, #tpu.dimension_semantics<parallel>], iteration_bounds = array<i64: 1, 1>, scalar_prefetch = 0 : i64, scratch_operands = 0 : i64, tpu.core_type = #tpu.core_type<tc>, window_params = [{transform_indices = @transform_0, window_bounds = array<i64: 16, 256>}, {transform_indices = @transform_1, window_bounds = array<i64: 256, 128>}, {transform_indices = @transform_2, window_bounds = array<i64: 1, 128>}, {transform_indices = @transform_3, window_bounds = array<i64: 16, 128>}]} {
    %c0 = arith.constant 0 : index
    %c0_0 = arith.constant 0 : index
    %0 = vector.load %arg2[%c0, %c0_0] : memref<16x256xbf16, #tpu.memory_space<vmem>>, vector<16x256xbf16>
    %c0_1 = arith.constant 0 : index
    %c0_2 = arith.constant 0 : index
    %1 = vector.load %arg3[%c0_1, %c0_2] : memref<256x128xbf16, #tpu.memory_space<vmem>>, vector<256x128xbf16>
    %cst = arith.constant dense<0.000000e+00> : vector<16x128xf32>
    %2 = tpu.matmul %0, %1, %cst {dimension_numbers = #tpu.dot_dimension_numbers<[1], [0], [0], [1], [0, 0, 1, 1], [], []>} : vector<16x256xbf16>, vector<256x128xbf16>, vector<16x128xf32> -> vector<16x128xf32>
    %c0_3 = arith.constant 0 : index
    %c0_4 = arith.constant 0 : index
    %3 = vector.load %arg4[%c0_3, %c0_4] : memref<1x128xf32, #tpu.memory_space<vmem>>, vector<1x128xf32>
    %4 = vector.broadcast %3 : vector<1x128xf32> to vector<16x128xf32>
    %5 = arith.addf %2, %4 : vector<16x128xf32>
    %c0_5 = arith.constant 0 : index
    %c0_6 = arith.constant 0 : index
    %6 = vector.load %arg5[%c0_5, %c0_6] : memref<16x128xf32, #tpu.memory_space<vmem>>, vector<16x128xf32>
    tpu.vector_store %arg5[%c0_5, %c0_6], %5 {strides = array<i32>} : memref<16x128xf32, #tpu.memory_space<vmem>>, vector<16x128xf32>,
    return
  }
  func.func @transform_0(%arg0: i32, %arg1: i32) -> (i32, i32) {
    %c0_i32 = arith.constant 0 : i32
    %c0_i32_0 = arith.constant 0 : i32
    return %arg1, %c0_i32 : i32, i32
  }
  func.func @transform_1(%arg0: i32, %arg1: i32) -> (i32, i32) {
    %c0_i32 = arith.constant 0 : i32
    %c0_i32_0 = arith.constant 0 : i32
    return %c0_i32, %arg0 : i32, i32
  }
  func.func @transform_2(%arg0: i32, %arg1: i32) -> (i32, i32) {
    %c0_i32 = arith.constant 0 : i32
    %c0_i32_0 = arith.constant 0 : i32
    return %c0_i32, %arg0 : i32, i32
  }
  func.func @transform_3(%arg0: i32, %arg1: i32) -> (i32, i32) {
    %c0_i32 = arith.constant 0 : i32
    return %arg1, %arg0 : i32, i32
  }
}

</mosaic_0001>

<bundles_post_ra>
// kernel: celora_linear_prepared.1
= control target key start
LH: loop header
LB: loop body
LE: loop exit
PB: predicated region body
PF: predicated region fallthrough
CT: control target
= control target key end

     0   :  { %8 = vsyncpa [#allocation3], 0  ;;  %s410_s0 = inlined_call_operand.vmem [shape: bf16[16,256], index: 0, kind: input, shape index: {}]   ;;  %s411_s1 = inlined_call_operand.hbm [shape: bf16[256,128], index: 1, kind: input, shape index: {}]   ;;  %s412_s2 = inlined_call_operand.vmem [shape: f32[1,128], index: 2, kind: input, shape index: {}]   ;;  %s413_s3 = inlined_call_operand.hbm [shape: f32[16,128], index: 3, kind: output, shape index: {}]  }
   0x1   :  { %9 = vsyncpa [#allocation4], 0  ;;  %s351_s12 = smov [#allocation2]   ;;  %s303_s16 = scalar_lea.hbm %s411_s1, 2048 }
   0x2   :  { %s17_s13 = sshll.u32 %s351_s12, 4  ;;  %p304_p0 = scmp.ne.s32.totalorder %s411_s1, %s303_s16  ;;  %s18_s13 = int_to_ptr.vmem [resolvable:$true] %s17_s13 }
   0x3   :  { %p307_p1 = scmp.lt.u32.totalorder %s303_s16, %s411_s1 }
   0x5   :  { %p309_p2 = pnand %p307_p1, %p304_p0 }
   0x7   :  { %312 = shalt.err (!%p309_p2)
}
   0x8   :  { %s313_s21 = scalar_lea.vmem %s18_s13, 2048  ;;  %p318_p4 = scmp.lt.s32.totalorder %s18_s13, %s18_s13 }
   0x9   :  { %p314_p3 = scmp.ne.s32.totalorder %s18_s13, %s313_s21  ;;  %p319_p5 = scmp.lt.s32.totalorder %s313_s21, %s313_s21 }
   0xb   :  { %p320_p6 = por %p319_p5, %p318_p4 }
   0xd   :  { %p321_p7 = pnand %p320_p6, %p314_p3 }
   0xf   :  { %324 = shalt.err (!%p321_p7)
}
  0x10   :  { %s352_s22 = smov 64   ;;  %s353_s23 = smov 4  }
  0x11   :  { %23 = dma.hbm_to_vmem [thread:$0]  %s411_s1, 2048, %s18_s13, [#allocation3], %s352_s22, %s352_s22, %s353_s23  }
  0x12   :  { %347 = dma.done.wait [#allocation3], 2048  }
  0x13   :  { %348 = vsyncadd [#allocation3], 4294965248  ;;  %v284_v0 = vld [vmem:[#allocation2 + $0x40] sm:$0xff]   ;;  %v286_v2 = vld [vmem:[#allocation2 + $0x48] sm:$0xff]   ;;  %s354_s4 = smov [#allocation5]  }
  0x14   :  { %v285_v1 = vld [vmem:[#allocation2] sm:$0xff]   ;;  %256 = vmatprep.subr.bf16.mxu0 %v284_v0  ;;  %v287_v3 = vld [vmem:[#allocation2 + $0x8] sm:$0xff]   ;;  %v288_v4 = vld [vmem:[#allocation2 + $0x50] sm:$0xff]   ;;  %s225_s5 = sshll.u32 %s354_s4, 4  ;;  %s226_s5 = int_to_ptr.vmem [resolvable:$true] %s225_s5 }
  0x15   :  { %257 = vmatpush3.bf16.msra.mxu0 %v285_v1  ;;  %v289_v5 = vld [vmem:[#allocation2 + $0x10] sm:$0xff]   ;;  %v290_v6 = vld [vmem:[#allocation2 + $0x58] sm:$0xff]   ;;  %v292_v8 = vld [vmem:[#allocation2 + $0x60] sm:$0xff]   ;;  %p330_p9 = scmp.lt.s32.totalorder %s226_s5, %s226_s5 }
  0x16   :  { %258 = vmatprep.subr.bf16.mxu0 %v286_v2  ;;  %v291_v7 = vld [vmem:[#allocation2 + $0x18] sm:$0xff]   ;;  %v293_v9 = vld [vmem:[#allocation2 + $0x20] sm:$0xff]   ;;  %v294_v10 = vld [vmem:[#allocation2 + $0x68] sm:$0xff]  }
  0x17   :  { %v302_v11 = vld [vmem:[%s410_s0 + $0x4] ss:$8 sps:$4 sm:$0xff]   ;;  %v296_v13 = vld [vmem:[#allocation2 + $0x70] sm:$0xff]   ;;  %v298_v15 = vld [vmem:[#allocation2 + $0x78] sm:$0xff]  }
  0x18   :  { %v295_v12 = vld [vmem:[#allocation2 + $0x28] sm:$0xff]   ;;  %209 = vmatprep.mubr.bf16.mxu0 %v302_v11  ;;  %v297_v14 = vld [vmem:[#allocation2 + $0x30] sm:$0xff]   ;;  %v299_v16 = vld [vmem:[#allocation2 + $0x38] sm:$0xff]  }
  0x19   :  { %259 = vmatpush3.bf16.msra.mxu0 %v287_v3  ;;  %v300_v17 = vld [vmem:[%s410_s0] ss:$8 sps:$4 sm:$0xff]   ;;  %s325_s0 = scalar_lea.vmem %s226_s5, 256 }
  0x1a   :  { %260 = vmatprep.subr.bf16.mxu0 %v288_v4  ;;  %v237_v19 = vld [vmem:[%s412_s2] ss:$0 sm:$0xff]  ;;  %p326_p8 = scmp.ne.s32.totalorder %s226_s5, %s325_s0  ;;  %p331_p10 = scmp.lt.s32.totalorder %s325_s0, %s325_s0 }
  0x1c   :  { %p332_p11 = por %p331_p10, %p330_p9 }
  0x1d   :  { %261 = vmatpush3.bf16.msra.mxu0 %v289_v5 }
  0x1e   :  { %262 = vmatprep.subr.bf16.mxu0 %v290_v6  ;;  %p333_p12 = pnand %p332_p11, %p326_p8 }
  0x21   :  { %263 = vmatpush3.bf16.msra.mxu0 %v291_v7 }
  0x22   :  { %264 = vmatprep.subr.bf16.mxu0 %v292_v8 }
  0x25   :  { %265 = vmatpush3.bf16.msra.mxu0 %v293_v9 }
  0x26   :  { %266 = vmatprep.subr.bf16.mxu0 %v294_v10 }
  0x29   :  { %267 = vmatpush3.bf16.msra.mxu0 %v295_v12 }
  0x2a   :  { %268 = vmatprep.subr.bf16.mxu0 %v296_v13 }
  0x2d   :  { %269 = vmatpush3.bf16.msra.mxu0 %v297_v14 }
  0x2e   :  { %270 = vmatprep.subr.bf16.mxu0 %v298_v15 }
  0x31   :  { %271 = vmatpush3.bf16.msra.mxu0 %v299_v16 }
  0x34   :  { %210 = vmatmul.mubr.bf16.vlgmr.msra.gmra.mrb[0].mxu0 %v300_v17 }
 0x107   :  { %v272_v18 = vpop.f32.mrb[0].mxu0 }
 0x108   :  { %v273_v20 = vpop.f32.mrb[1].mxu0 }
 0x109   :  { %v274_v21 = vadd.f32 %v273_v20, %v272_v18  ;;  %v275_v22 = vpop.f32.mrb[2].mxu0 }
 0x10a   :  { %v276_v23 = vpop.f32.mrb[3].mxu0 }
 0x10b   :  { %v212_v24 = vadd.f32 %v274_v21, %v237_v19  ;;  %v277_v25 = vadd.f32 %v276_v23, %v275_v22 }
 0x10d   :  { %218 = vst [vmem:[#allocation5] sm:$0xff] %v212_v24  ;;  %v215_v26 = vadd.f32 %v277_v25, %v237_v19 }
 0x10f   :  { %219 = vst [vmem:[#allocation5 + $0x8] sm:$0xff] %v215_v26 }
 0x110   :  { %336 = shalt.err (!%p333_p12)
}
 0x111   :  { %s337_s7 = scalar_lea.hbm %s413_s3, 256 }
 0x112   :  { %p338_p13 = scmp.ne.s32.totalorder %s413_s3, %s337_s7  ;;  %p341_p0 = scmp.lt.u32.totalorder %s337_s7, %s413_s3 }
 0x114   :  { %p343_p1 = pnand %p341_p0, %p338_p13 }
 0x116   :  { %346 = shalt.err (!%p343_p1)
}
 0x117   :  { %s355_s12 = smov 128   ;;  %s356_s13 = smov 8  }
 0x118   :  { %231 = dma.vmem_to_hbm [thread:$0]  %s226_s5, 256, %s413_s3, [#allocation4], %s355_s12, %s355_s12, %s356_s13  }
 0x119   :  { %349 = dma.done.wait [#allocation4], 256  }
 0x11a   :  { %350 = vsyncadd [#allocation4], 4294967040 }
 0x11b   :  { %235 = vsyncpa [#allocation3], 1 }
 0x11c   :  { %236 = vsyncpa [#allocation4], 1 }

</bundles_post_ra>
